<compile_context>
chip_gen: v5e
topology: v5e:2x2
jax: 0.10.0
libtpu: 0.0.40
codegen_flags: <defaults>
</compile_context>

<pallas_src>
import jax
import jax.numpy as jnp
from jax.experimental import pallas as pl
from jax.experimental.pallas import tpu as pltpu

_LANE = 128
_MIB = 1024 * 1024
# Per-operand single-block fast-path threshold.  Kept small (512 KiB) so that
# mid-size inputs take a >=2-step "parallel" grid and can shard across v7x's
# two TensorCores (two DMA streams) instead of running on one core.
_SINGLE_BLOCK_BYTES = 512 * 1024


def _add_kernel(x_ref, y_ref, o_ref):
    o_ref[...] = x_ref[...] + y_ref[...]


def _round_up(a, b):
    return ((a + b - 1) // b) * b


def _vmem_capacity_bytes():
    try:
        return int(pltpu.get_tpu_info().vmem_capacity_bytes)
    except Exception:
        return 64 * _MIB  # conservative fallback (v7x per-core VMEM)


def pallas_add(x, y):
    """Elementwise x + y via a Pallas TPU kernel (same shape & dtype inputs)."""
    assert x.shape == y.shape and x.dtype == y.dtype
    orig_shape = x.shape
    n = x.size
    itemsize = jnp.dtype(x.dtype).itemsize
    # Sublane packing factor: 8 rows/f32, 16 rows/bf16, 32 rows/int8-fp8.
    sub = max(8, 32 // itemsize)

    if n % _LANE == 0:
        # Lane-aligned (covers the NCHW test shape and most activation shapes):
        # free reshape to a lane-dense slab, no extra HBM passes for pad/slice.
        # Sublane alignment is only required of the BlockSpec (kept below), so
        # a ragged last block on the cdiv grid is fine.
        rows = n // _LANE
        xf = x.reshape(rows, _LANE)
        yf = y.reshape(rows, _LANE)
        padded = False
    else:
        # Fallback only for non-lane-aligned element counts: zero-pad to a
        # sublane-aligned slab (harmless for add), slice afterwards.
        rows = _round_up(pl.cdiv(n, _LANE), sub)
        total = rows * _LANE
        xf = jnp.pad(x.reshape(-1), (0, total - n)).reshape(rows, _LANE)
        yf = jnp.pad(y.reshape(-1), (0, total - n)).reshape(rows, _LANE)
        padded = True

    block_bytes = rows * _LANE * itemsize
    out_shape = jax.ShapeDtypeStruct((rows, _LANE), x.dtype)
    # Bandwidth-bound hint for XLA's scheduler: 1 flop/elem, 3 bytes-moved/elem.
    cost = pl.CostEstimate(
        flops=rows * _LANE,
        transcendentals=0,
        bytes_accessed=3 * rows * _LANE * itemsize,
    )

    if block_bytes <= _SINGLE_BLOCK_BYTES:
        # Small input: one whole-array block (block == full array dims, so the
        # (8,128) divisibility rule does not apply), no grid machinery.
        out = pl.pallas_call(_add_kernel, out_shape=out_shape,
                             cost_estimate=cost)(xf, yf)
    else:
        # Streaming path: big sublane-aligned tiles on a cdiv grid, sized from
        # the device's actual VMEM capacity.
        vmem_cap = _vmem_capacity_bytes()
        # >=25% headroom on v7x (64 MiB physical); cap at 64 MiB on v5e/v6e.
        vmem_limit = min(64 * _MIB, (vmem_cap * 3) // 4)
        # 3 operands x 2 pipeline buffers; ~limit/8 per block => ~6 MiB on v7x,
        # 8 MiB on v5e/v6e, never below the 2 MiB plateau floor.
        target_block_bytes = max(2 * _MIB, vmem_limit // 8)
        tile_r = max(sub, (target_block_bytes // (_LANE * itemsize)) // sub * sub)
        # Guarantee >=2 grid steps so the "parallel" axis can shard across both
        # v7x TensorCores (a grid of 1 runs on a single core).
        tile_r = min(tile_r, _round_up(pl.cdiv(rows, 2), sub))
        grid = (pl.cdiv(rows, tile_r),)
        out = pl.pallas_call(
            _add_kernel,
            out_shape=out_shape,
            grid_spec=pl.GridSpec(
                grid=grid,
                in_specs=[
                    pl.BlockSpec((tile_r, _LANE), lambda i: (i, 0)),
                    pl.BlockSpec((tile_r, _LANE), lambda i: (i, 0)),
                ],
                out_specs=pl.BlockSpec((tile_r, _LANE), lambda i: (i, 0)),
            ),
            compiler_params=pltpu.CompilerParams(
                dimension_semantics=("parallel",),
                vmem_limit_bytes=vmem_limit,
            ),
            cost_estimate=cost,
        )(xf, yf)

    if padded:
        return out.reshape(-1)[:n].reshape(orig_shape)
    return out.reshape(orig_shape)


if __name__ == "__main__":
    key = jax.random.PRNGKey(0)
    kx, ky = jax.random.split(key)

    # Primary test shape (NCHW conv activations): single-block fast path.
    shape = (2, 4, 16, 16)
    x = jax.random.normal(kx, shape, dtype=jnp.float32)
    y = jax.random.normal(ky, shape, dtype=jnp.float32)
    out = pallas_add(x, y)
    jax.block_until_ready(out)
    expected = x + y
    assert out.shape == expected.shape
    assert jnp.allclose(out, expected, atol=1e-6, rtol=1e-6)

    # Large input: exercises the >=2-step streaming grid path.
    big_x = jax.random.normal(kx, (1024, 2048), dtype=jnp.float32)
    big_y = jax.random.normal(ky, (1024, 2048), dtype=jnp.float32)
    out_big = pallas_add(big_x, big_y)
    jax.block_until_ready(out_big)
    assert jnp.allclose(out_big, big_x + big_y, atol=1e-6, rtol=1e-6)

    # Lane-aligned but not granule-aligned bf16: exercises the relaxed no-pad
    # condition (n % 128 == 0 but n % (16*128) != 0).
    bx = jax.random.normal(kx, (8, 128), dtype=jnp.bfloat16)
    by = jax.random.normal(ky, (8, 128), dtype=jnp.bfloat16)
    out_b = pallas_add(bx, by)
    jax.block_until_ready(out_b)
    assert jnp.allclose(out_b.astype(jnp.float32),
                        (bx + by).astype(jnp.float32), atol=1e-2, rtol=1e-2)

    # Non-lane-aligned shape: exercises the pad/slice fallback.
    odd_x = jax.random.normal(kx, (3, 5, 7), dtype=jnp.float32)
    odd_y = jax.random.normal(ky, (3, 5, 7), dtype=jnp.float32)
    out_odd = pallas_add(odd_x, odd_y)
    jax.block_until_ready(out_odd)
    assert jnp.allclose(out_odd, odd_x + odd_y, atol=1e-6, rtol=1e-6)

    print("KERNEL_OK")
</pallas_src>

<mosaic_0001>
module attributes {stable_mosaic.version = 11 : i64} {
  func.func @_add_kernel(%arg0: memref<16x128xf32, #tpu.memory_space<vmem>>, %arg1: memref<16x128xf32, #tpu.memory_space<vmem>>, %arg2: memref<16x128xf32, #tpu.memory_space<vmem>>) attributes {dimension_semantics = [], scalar_prefetch = 0 : i64, scratch_operands = 0 : i64, tpu.core_type = #tpu.core_type<tc>} {
    %c0 = arith.constant 0 : index
    %c0_0 = arith.constant 0 : index
    %0 = vector.load %arg0[%c0, %c0_0] : memref<16x128xf32, #tpu.memory_space<vmem>>, vector<16x128xf32>
    %c0_1 = arith.constant 0 : index
    %c0_2 = arith.constant 0 : index
    %1 = vector.load %arg1[%c0_1, %c0_2] : memref<16x128xf32, #tpu.memory_space<vmem>>, vector<16x128xf32>
    %2 = arith.addf %0, %1 : vector<16x128xf32>
    %c0_3 = arith.constant 0 : index
    %c0_4 = arith.constant 0 : index
    %3 = vector.load %arg2[%c0_3, %c0_4] : memref<16x128xf32, #tpu.memory_space<vmem>>, vector<16x128xf32>
    tpu.vector_store %arg2[%c0_3, %c0_4], %2 {strides = array<i32>} : memref<16x128xf32, #tpu.memory_space<vmem>>, vector<16x128xf32>,
    return
  }
}

</mosaic_0001>

<bundles_post_ra>
// kernel: tpu_custom_call.1
= control target key start
LH: loop header
LB: loop body
LE: loop exit
PB: predicated region body
PF: predicated region fallthrough
CT: control target
= control target key end

     0   :  { %7 = vsyncpa [#allocation3], 0  ;;  %s184_s0 = inlined_call_operand.hbm [shape: f32[16,128], index: 0, kind: input, shape index: {}]   ;;  %s185_s1 = inlined_call_operand.hbm [shape: f32[16,128], index: 1, kind: input, shape index: {}]   ;;  %s186_s2 = inlined_call_operand.hbm [shape: f32[16,128], index: 2, kind: output, shape index: {}]  }
   0x1   :  { %8 = vsyncpa [#allocation6], 0 }
   0x2   :  { %9 = vsyncpa [#allocation4], 0  ;;  %s14_s11 = sshll.u32 %s184_s0, 4  ;;  %s155_s12 = smov [#allocation2]   ;;  %s15_s11 = int_to_ptr.hbm [resolvable:$true] %s14_s11 }
   0x3   :  { %s16_s13 = sshll.u32 %s155_s12, 4  ;;  %s27_s16 = sshll.u32 %s185_s1, 4  ;;  %s17_s13 = int_to_ptr.vmem [resolvable:$true] %s16_s13  ;;  %s28_s16 = int_to_ptr.hbm [resolvable:$true] %s27_s16 }
   0x4   :  { %s156_s17 = smov 128   ;;  %s157_s18 = smov 8  }
   0x5   :  { %22 = dma.hbm_to_vmem [thread:$0]  %s15_s11, 256, %s17_s13, [#allocation3], %s156_s17, %s156_s17, %s157_s18  }
   0x6   :  { %s158_s19 = smov [#allocation5]  }
   0x7   :  { %s29_s20 = sshll.u32 %s158_s19, 4  ;;  %s30_s20 = int_to_ptr.vmem [resolvable:$true] %s29_s20 }
   0x8   :  { %35 = dma.hbm_to_vmem [thread:$0]  %s28_s16, 256, %s30_s20, [#allocation6], %s156_s17, %s156_s17, %s157_s18  }
   0x9   :  { %149 = dma.done.wait [#allocation3], 256  }
   0xa   :  { %150 = vsyncadd [#allocation3], 4294967040 }
   0xb   :  { %151 = dma.done.wait [#allocation6], 256  }
   0xc   :  { %152 = vsyncadd [#allocation6], 4294967040  ;;  %s159_s0 = smov [#allocation7]   ;;  %s58_s24 = sshll.u32 %s186_s2, 4  ;;  %v44_v0 = vld [vmem:[#allocation2] sm:$0xff]  ;;  %v46_v1 = vld [vmem:[#allocation5] sm:$0xff]  ;;  %s59_s24 = int_to_ptr.hbm [resolvable:$true] %s58_s24 }
   0xd   :  { %s56_s21 = sshll.u32 %s159_s0, 4  ;;  %v45_v2 = vld [vmem:[#allocation2 + $0x8] sm:$0xff]  ;;  %v48_v3 = vadd.f32 %v46_v1, %v44_v0  ;;  %v47_v4 = vld [vmem:[#allocation5 + $0x8] sm:$0xff]  ;;  %s57_s21 = int_to_ptr.vmem [resolvable:$true] %s56_s21 }
   0xe   :  { %v49_v5 = vadd.f32 %v47_v4, %v45_v2 }
   0xf   :  { %50 = vst [vmem:[#allocation7] sm:$0xff] %v48_v3 }
  0x10   :  { %51 = vst [vmem:[#allocation7 + $0x8] sm:$0xff] %v49_v5 }
  0x11   :  { %64 = dma.vmem_to_hbm [thread:$0]  %s57_s21, 256, %s59_s24, [#allocation4], %s156_s17, %s156_s17, %s157_s18  }
  0x12   :  { %153 = dma.done.wait [#allocation4], 256  }
  0x13   :  { %154 = vsyncadd [#allocation4], 4294967040 }
  0x14   :  { %69 = vsyncpa [#allocation3], 1 }
  0x15   :  { %70 = vsyncpa [#allocation6], 1 }
  0x16   :  { %71 = vsyncpa [#allocation4], 1 }

</bundles_post_ra>
